<compile_context>
chip_gen: v7x
topology: tpu7x:2x2x1
jax: 0.10.0
libtpu: 0.0.40
codegen_flags: <defaults>
</compile_context>

<pallas_src>
import functools

import jax
import jax.numpy as jnp
from jax import lax
from jax.experimental import pallas as pl
from jax.experimental.pallas import tpu as pltpu


def _softplus(x):
    # matches torch.nn.Softplus(beta=1, threshold=20)
    return jnp.where(x > 20.0, x, jnp.log1p(jnp.exp(jnp.minimum(x, 20.0))))


def _kl_ind_standard(loc, scale):
    # KL( N(loc, diag(scale^2)) || N(0, I) ), summed over latent dim -> (B, 1)
    return jnp.sum(0.5 * (scale * scale + loc * loc - 1.0) - jnp.log(scale),
                   axis=-1, keepdims=True)


def encoder_mf_kernel(x_ref, w1_ref, b1_ref, w2_ref, b2_ref,
                      w3l_ref, b3l_ref, w3s_ref, b3s_ref,
                      eps_ref, z_ref, kl_ref, *, latent_size, n_samples):
    L, S = latent_size, n_samples
    x = x_ref[...].astype(jnp.float32)

    # inference network: Linear -> ReLU -> Linear -> ReLU -> {loc head, scale head} (MXU)
    h1 = jnp.maximum(
        jnp.dot(x, w1_ref[...], preferred_element_type=jnp.float32) + b1_ref[...], 0.0)
    h2 = jnp.maximum(
        jnp.dot(h1, w2_ref[...], preferred_element_type=jnp.float32) + b2_ref[...], 0.0)
    # split heads avoid slicing a single (H, 2L) output at lane offset L
    loc = jnp.dot(h2, w3l_ref[...], preferred_element_type=jnp.float32) + b3l_ref[...]
    scale = _softplus(
        jnp.dot(h2, w3s_ref[...], preferred_element_type=jnp.float32) + b3s_ref[...])

    # Constant 0/1 helper matrices (built from iota; all work stays lane-dense):
    #   rep_mat (L, S*L):  rep_mat[l, s*L + l'] = (l == l')   -> replicate over samples
    #   sum_mat (S*L, L):  sum_mat[s*L + l, l'] = (l == l')   -> sum over samples
    row_r = lax.broadcasted_iota(jnp.int32, (L, S * L), 0)
    col_r = lax.broadcasted_iota(jnp.int32, (L, S * L), 1) % L
    rep_mat = (row_r == col_r).astype(jnp.float32)
    row_s = lax.broadcasted_iota(jnp.int32, (S * L, L), 0) % L
    col_s = lax.broadcasted_iota(jnp.int32, (S * L, L), 1)
    sum_mat = (row_s == col_s).astype(jnp.float32)

    # reparameterized sampling in lane-dense (B, S*L) layout:
    #   z[b, s*L + l] = loc[b, l] + scale[b, l] * eps[b, s*L + l]
    eps = eps_ref[...]                                                     # (B, S*L)
    loc_rep = jnp.dot(loc, rep_mat, preferred_element_type=jnp.float32)    # (B, S*L)
    scale_rep = jnp.dot(scale, rep_mat, preferred_element_type=jnp.float32)
    z_ref[...] = loc_rep + scale_rep * eps                                 # unmasked store

    # empirical statistics over the samples axis, exact algebraic form:
    #   loc2   = loc + scale * mean_s(eps)
    #   scale2 = scale * std_s(eps)          (unbiased, matches torch.std)
    mean_eps = jnp.dot(eps, sum_mat, preferred_element_type=jnp.float32) / S      # (B, L)
    cen = eps - jnp.dot(mean_eps, rep_mat, preferred_element_type=jnp.float32)    # (B, S*L)
    var_eps = jnp.dot(cen * cen, sum_mat,
                      preferred_element_type=jnp.float32) / (S - 1)                # (B, L)
    std_eps = jnp.sqrt(var_eps)

    loc2 = loc + scale * mean_eps
    scale2 = scale * std_eps

    # analytic_score: KL(Independent Normal || standard Normal), per batch row,
    # packed into one (B, 2) output (single output DMA instead of two).
    kl_ref[:, 0:1] = _kl_ind_standard(loc, scale)
    kl_ref[:, 1:2] = _kl_ind_standard(loc2, scale2)


def encoder_mf_forward(x, params, eps, latent_size):
    """Returns (z, score_enc, score2) matching EncoderMF.forward with use_metric=1."""
    B = x.shape[0]
    S, L = eps.shape[1], eps.shape[2]
    w1, b1, w2, b2, w3, b3 = params

    # layout plumbing in the wrapper (free): split the final layer into loc / scale
    # heads, and flatten eps to the lane-dense (B, S*L) layout used inside the kernel.
    w3l, w3s = w3[:, :L], w3[:, L:]
    b3l, b3s = b3[:, :L], b3[:, L:]
    eps_flat = eps.reshape(B, S * L)

    vmem = pl.BlockSpec(memory_space=pltpu.MemorySpace.VMEM)
    kernel = functools.partial(encoder_mf_kernel, latent_size=L, n_samples=S)

    # NOTE: at these sizes (a few KiB of weights, B=8) a grid-less single call is
    # optimal; if B grows to hundreds of rows, add a batch grid with blocks
    # (tile_B, D)/(tile_B, S*L), resident weights, and dimension_semantics=("parallel",).
    z_flat, kl = pl.pallas_call(
        kernel,
        in_specs=[vmem] * 10,
        out_specs=(vmem, vmem),
        out_shape=(
            jax.ShapeDtypeStruct((B, S * L), jnp.float32),   # z, lane-dense
            jax.ShapeDtypeStruct((B, 2), jnp.float32),       # [KL(loc,scale), KL(loc2,scale2)]
        ),
    )(x, w1, b1, w2, b2, w3l, b3l, w3s, b3s, eps_flat)

    z = z_flat.reshape(B, S, L)
    # analytic_score squeezes to per-batch scalars -> shape (B,)
    return z, kl[:, 0], kl[:, 1]


def _ref_forward(x, params, eps, L):
    """Pure-JAX reference of the PyTorch module semantics (use_metric=1)."""
    w1, b1, w2, b2, w3, b3 = params
    h1 = jax.nn.relu(x @ w1 + b1)
    h2 = jax.nn.relu(h1 @ w2 + b2)
    out = h2 @ w3 + b3
    loc, scale_arg = out[:, :L], out[:, L:]
    scale = jax.nn.softplus(scale_arg)
    z = loc[:, None, :] + scale[:, None, :] * eps
    loc2 = z.mean(axis=1)
    scale2 = jnp.std(z, axis=1, ddof=1)
    kl = lambda m, s: jnp.sum(0.5 * (s * s + m * m - 1.0) - jnp.log(s), axis=-1)
    return z, kl(loc, scale), kl(loc2, scale2)


if __name__ == "__main__":
    # cfg: data_size=32, latent_size=16 (hidden = 2*latent = 32),
    #      batch_size=8, n_samples=8, use_metric=1   (note S*L = 128, one vreg row)
    B, D, L, S = 8, 32, 16, 8
    H = 2 * L

    key = jax.random.PRNGKey(0)
    keys = jax.random.split(key, 8)

    def linear_init(kw, kb, fan_in, fan_out):
        # deterministic init mimicking torch.nn.Linear's U(-1/sqrt(fan_in), 1/sqrt(fan_in))
        bound = 1.0 / float(jnp.sqrt(float(fan_in)))
        w = jax.random.uniform(kw, (fan_in, fan_out), jnp.float32, -bound, bound)
        b = jax.random.uniform(kb, (1, fan_out), jnp.float32, -bound, bound)
        return w, b

    w1, b1 = linear_init(keys[0], keys[1], D, H)
    w2, b2 = linear_init(keys[2], keys[3], H, H)
    w3, b3 = linear_init(keys[4], keys[5], H, 2 * L)
    params = (w1, b1, w2, b2, w3, b3)

    x = jax.random.normal(keys[6], (B, D), jnp.float32)
    eps = jax.random.normal(keys[7], (B, S, L), jnp.float32)

    z, score_enc, score2 = encoder_mf_forward(x, params, eps, L)
    jax.block_until_ready((z, score_enc, score2))

    z_ref, s1_ref, s2_ref = _ref_forward(x, params, eps, L)
    assert z.shape == (B, S, L) and score_enc.shape == (B,) and score2.shape == (B,)
    assert jnp.allclose(z, z_ref, atol=1e-2, rtol=1e-2)
    assert jnp.allclose(score_enc, s1_ref, atol=1e-2, rtol=1e-2)
    assert jnp.allclose(score2, s2_ref, atol=1e-2, rtol=1e-2)

    print("KERNEL_OK")
</pallas_src>

<mosaic_0001>
module attributes {stable_mosaic.version = 11 : i64} {
  func.func @encoder_mf_kernel(%arg0: memref<8x32xf32, #tpu.memory_space<vmem>>, %arg1: memref<32x32xf32, #tpu.memory_space<vmem>>, %arg2: memref<1x32xf32, #tpu.memory_space<vmem>>, %arg3: memref<32x32xf32, #tpu.memory_space<vmem>>, %arg4: memref<1x32xf32, #tpu.memory_space<vmem>>, %arg5: memref<32x16xf32, #tpu.memory_space<vmem>>, %arg6: memref<1x16xf32, #tpu.memory_space<vmem>>, %arg7: memref<32x16xf32, #tpu.memory_space<vmem>>, %arg8: memref<1x16xf32, #tpu.memory_space<vmem>>, %arg9: memref<8x128xf32, #tpu.memory_space<vmem>>, %arg10: memref<8x128xf32, #tpu.memory_space<vmem>>, %arg11: memref<8x2xf32, #tpu.memory_space<vmem>>) attributes {dimension_semantics = [], scalar_prefetch = 0 : i64, scratch_operands = 0 : i64, tpu.core_type = #tpu.core_type<tc>} {
    %c0 = arith.constant 0 : index
    %c0_0 = arith.constant 0 : index
    %0 = vector.load %arg0[%c0, %c0_0] : memref<8x32xf32, #tpu.memory_space<vmem>>, vector<8x32xf32>
    %c0_1 = arith.constant 0 : index
    %c0_2 = arith.constant 0 : index
    %1 = vector.load %arg1[%c0_1, %c0_2] : memref<32x32xf32, #tpu.memory_space<vmem>>, vector<32x32xf32>
    %cst = arith.constant dense<0.000000e+00> : vector<8x32xf32>
    %2 = tpu.matmul %0, %1, %cst {dimension_numbers = #tpu.dot_dimension_numbers<[1], [0], [0], [1], [0, 0, 1, 1], [], []>} : vector<8x32xf32>, vector<32x32xf32>, vector<8x32xf32> -> vector<8x32xf32>
    %c0_3 = arith.constant 0 : index
    %c0_4 = arith.constant 0 : index
    %3 = vector.load %arg2[%c0_3, %c0_4] : memref<1x32xf32, #tpu.memory_space<vmem>>, vector<1x32xf32>
    %4 = vector.broadcast %3 : vector<1x32xf32> to vector<8x32xf32>
    %5 = arith.addf %2, %4 : vector<8x32xf32>
    %cst_5 = arith.constant 0.000000e+00 : f32
    %6 = vector.broadcast %cst_5 : f32 to vector<8x32xf32>
    %7 = arith.maximumf %5, %6 : vector<8x32xf32>
    %c0_6 = arith.constant 0 : index
    %c0_7 = arith.constant 0 : index
    %8 = vector.load %arg3[%c0_6, %c0_7] : memref<32x32xf32, #tpu.memory_space<vmem>>, vector<32x32xf32>
    %cst_8 = arith.constant dense<0.000000e+00> : vector<8x32xf32>
    %9 = tpu.matmul %7, %8, %cst_8 {dimension_numbers = #tpu.dot_dimension_numbers<[1], [0], [0], [1], [0, 0, 1, 1], [], []>} : vector<8x32xf32>, vector<32x32xf32>, vector<8x32xf32> -> vector<8x32xf32>
    %c0_9 = arith.constant 0 : index
    %c0_10 = arith.constant 0 : index
    %10 = vector.load %arg4[%c0_9, %c0_10] : memref<1x32xf32, #tpu.memory_space<vmem>>, vector<1x32xf32>
    %11 = vector.broadcast %10 : vector<1x32xf32> to vector<8x32xf32>
    %12 = arith.addf %9, %11 : vector<8x32xf32>
    %cst_11 = arith.constant 0.000000e+00 : f32
    %13 = vector.broadcast %cst_11 : f32 to vector<8x32xf32>
    %14 = arith.maximumf %12, %13 : vector<8x32xf32>
    %c0_12 = arith.constant 0 : index
    %c0_13 = arith.constant 0 : index
    %15 = vector.load %arg5[%c0_12, %c0_13] : memref<32x16xf32, #tpu.memory_space<vmem>>, vector<32x16xf32>
    %cst_14 = arith.constant dense<0.000000e+00> : vector<8x16xf32>
    %16 = tpu.matmul %14, %15, %cst_14 {dimension_numbers = #tpu.dot_dimension_numbers<[1], [0], [0], [1], [0, 0, 1, 1], [], []>} : vector<8x32xf32>, vector<32x16xf32>, vector<8x16xf32> -> vector<8x16xf32>
    %c0_15 = arith.constant 0 : index
    %c0_16 = arith.constant 0 : index
    %17 = vector.load %arg6[%c0_15, %c0_16] : memref<1x16xf32, #tpu.memory_space<vmem>>, vector<1x16xf32>
    %18 = vector.broadcast %17 : vector<1x16xf32> to vector<8x16xf32>
    %19 = arith.addf %16, %18 : vector<8x16xf32>
    %c0_17 = arith.constant 0 : index
    %c0_18 = arith.constant 0 : index
    %20 = vector.load %arg7[%c0_17, %c0_18] : memref<32x16xf32, #tpu.memory_space<vmem>>, vector<32x16xf32>
    %cst_19 = arith.constant dense<0.000000e+00> : vector<8x16xf32>
    %21 = tpu.matmul %14, %20, %cst_19 {dimension_numbers = #tpu.dot_dimension_numbers<[1], [0], [0], [1], [0, 0, 1, 1], [], []>} : vector<8x32xf32>, vector<32x16xf32>, vector<8x16xf32> -> vector<8x16xf32>
    %c0_20 = arith.constant 0 : index
    %c0_21 = arith.constant 0 : index
    %22 = vector.load %arg8[%c0_20, %c0_21] : memref<1x16xf32, #tpu.memory_space<vmem>>, vector<1x16xf32>
    %23 = vector.broadcast %22 : vector<1x16xf32> to vector<8x16xf32>
    %24 = arith.addf %21, %23 : vector<8x16xf32>
    %cst_22 = arith.constant 2.000000e+01 : f32
    %25 = vector.broadcast %cst_22 : f32 to vector<8x16xf32>
    %26 = arith.cmpf ogt, %24, %25 : vector<8x16xf32>
    %cst_23 = arith.constant 2.000000e+01 : f32
    %27 = vector.broadcast %cst_23 : f32 to vector<8x16xf32>
    %28 = arith.minimumf %24, %27 : vector<8x16xf32>
    %29 = math.exp %28 : vector<8x16xf32>
    %30 = math.log1p %29 : vector<8x16xf32>
    %31 = arith.select %26, %24, %30 : vector<8x16xi1>, vector<8x16xf32>
    %32 = tpu.iota {dimensions = array<i32: 0>} : vector<16x128xi32>
    %33 = tpu.iota {dimensions = array<i32: 1>} : vector<16x128xi32>
    %c16_i32 = arith.constant 16 : i32
    %c0_i32 = arith.constant 0 : i32
    %34 = arith.cmpi eq, %c16_i32, %c0_i32 : i32
    %c1_i32 = arith.constant 1 : i32
    %35 = arith.select %34, %c1_i32, %c16_i32 : i32
    %36 = vector.broadcast %35 : i32 to vector<16x128xi32>
    %37 = arith.remsi %33, %36 : vector<16x128xi32>
    %c0_i32_24 = arith.constant 0 : i32
    %38 = vector.broadcast %c0_i32_24 : i32 to vector<16x128xi32>
    %39 = arith.cmpi ne, %37, %38 : vector<16x128xi32>
    %c0_i32_25 = arith.constant 0 : i32
    %40 = vector.broadcast %c0_i32_25 : i32 to vector<16x128xi32>
    %41 = arith.cmpi slt, %37, %40 : vector<16x128xi32>
    %c0_i32_26 = arith.constant 0 : i32
    %42 = arith.cmpi slt, %35, %c0_i32_26 : i32
    %43 = vector.broadcast %42 : i1 to vector<16x128xi1>
    %44 = vector.broadcast %43 : vector<16x128xi1> to vector<16x128xi1>
    %45 = arith.xori %41, %44 : vector<16x128xi1>
    %46 = arith.andi %45, %39 : vector<16x128xi1>
    %47 = vector.broadcast %35 : i32 to vector<16x128xi32>
    %48 = arith.addi %37, %47 : vector<16x128xi32>
    %49 = arith.select %46, %48, %37 : vector<16x128xi1>, vector<16x128xi32>
    %50 = arith.cmpi eq, %32, %49 : vector<16x128xi32>
    %51 = arith.extui %50 : vector<16x128xi1> to vector<16x128xi32>
    %52 = arith.sitofp %51 : vector<16x128xi32> to vector<16x128xf32>
    %53 = tpu.iota {dimensions = array<i32: 0>} : vector<128x16xi32>
    %c16_i32_27 = arith.constant 16 : i32
    %c0_i32_28 = arith.constant 0 : i32
    %54 = arith.cmpi eq, %c16_i32_27, %c0_i32_28 : i32
    %c1_i32_29 = arith.constant 1 : i32
    %55 = arith.select %54, %c1_i32_29, %c16_i32_27 : i32
    %56 = vector.broadcast %55 : i32 to vector<128x16xi32>
    %57 = arith.remsi %53, %56 : vector<128x16xi32>
    %c0_i32_30 = arith.constant 0 : i32
    %58 = vector.broadcast %c0_i32_30 : i32 to vector<128x16xi32>
    %59 = arith.cmpi ne, %57, %58 : vector<128x16xi32>
    %c0_i32_31 = arith.constant 0 : i32
    %60 = vector.broadcast %c0_i32_31 : i32 to vector<128x16xi32>
    %61 = arith.cmpi slt, %57, %60 : vector<128x16xi32>
    %c0_i32_32 = arith.constant 0 : i32
    %62 = arith.cmpi slt, %55, %c0_i32_32 : i32
    %63 = vector.broadcast %62 : i1 to vector<128x16xi1>
    %64 = vector.broadcast %63 : vector<128x16xi1> to vector<128x16xi1>
    %65 = arith.xori %61, %64 : vector<128x16xi1>
    %66 = arith.andi %65, %59 : vector<128x16xi1>
    %67 = vector.broadcast %55 : i32 to vector<128x16xi32>
    %68 = arith.addi %57, %67 : vector<128x16xi32>
    %69 = arith.select %66, %68, %57 : vector<128x16xi1>, vector<128x16xi32>
    %70 = tpu.iota {dimensions = array<i32: 1>} : vector<128x16xi32>
    %71 = arith.cmpi eq, %69, %70 : vector<128x16xi32>
    %72 = arith.extui %71 : vector<128x16xi1> to vector<128x16xi32>
    %73 = arith.sitofp %72 : vector<128x16xi32> to vector<128x16xf32>
    %c0_33 = arith.constant 0 : index
    %c0_34 = arith.constant 0 : index
    %74 = vector.load %arg9[%c0_33, %c0_34] : memref<8x128xf32, #tpu.memory_space<vmem>>, vector<8x128xf32>
    %cst_35 = arith.constant dense<0.000000e+00> : vector<8x128xf32>
    %75 = tpu.matmul %19, %52, %cst_35 {dimension_numbers = #tpu.dot_dimension_numbers<[1], [0], [0], [1], [0, 0, 1, 1], [], []>} : vector<8x16xf32>, vector<16x128xf32>, vector<8x128xf32> -> vector<8x128xf32>
    %cst_36 = arith.constant dense<0.000000e+00> : vector<8x128xf32>
    %76 = tpu.matmul %31, %52, %cst_36 {dimension_numbers = #tpu.dot_dimension_numbers<[1], [0], [0], [1], [0, 0, 1, 1], [], []>} : vector<8x16xf32>, vector<16x128xf32>, vector<8x128xf32> -> vector<8x128xf32>
    %77 = arith.mulf %76, %74 : vector<8x128xf32>
    %78 = arith.addf %75, %77 : vector<8x128xf32>
    %c0_37 = arith.constant 0 : index
    %c0_38 = arith.constant 0 : index
    %79 = vector.load %arg10[%c0_37, %c0_38] : memref<8x128xf32, #tpu.memory_space<vmem>>, vector<8x128xf32>
    tpu.vector_store %arg10[%c0_37, %c0_38], %78 {strides = array<i32>} : memref<8x128xf32, #tpu.memory_space<vmem>>, vector<8x128xf32>,
    %cst_39 = arith.constant dense<0.000000e+00> : vector<8x16xf32>
    %80 = tpu.matmul %74, %73, %cst_39 {dimension_numbers = #tpu.dot_dimension_numbers<[1], [0], [0], [1], [0, 0, 1, 1], [], []>} : vector<8x128xf32>, vector<128x16xf32>, vector<8x16xf32> -> vector<8x16xf32>
    %cst_40 = arith.constant 8.000000e+00 : f32
    %81 = vector.broadcast %cst_40 : f32 to vector<8x16xf32>
    %82 = arith.divf %80, %81 : vector<8x16xf32>
    %cst_41 = arith.constant dense<0.000000e+00> : vector<8x128xf32>
    %83 = tpu.matmul %82, %52, %cst_41 {dimension_numbers = #tpu.dot_dimension_numbers<[1], [0], [0], [1], [0, 0, 1, 1], [], []>} : vector<8x16xf32>, vector<16x128xf32>, vector<8x128xf32> -> vector<8x128xf32>
    %84 = arith.subf %74, %83 : vector<8x128xf32>
    %85 = arith.mulf %84, %84 : vector<8x128xf32>
    %cst_42 = arith.constant dense<0.000000e+00> : vector<8x16xf32>
    %86 = tpu.matmul %85, %73, %cst_42 {dimension_numbers = #tpu.dot_dimension_numbers<[1], [0], [0], [1], [0, 0, 1, 1], [], []>} : vector<8x128xf32>, vector<128x16xf32>, vector<8x16xf32> -> vector<8x16xf32>
    %cst_43 = arith.constant 7.000000e+00 : f32
    %87 = vector.broadcast %cst_43 : f32 to vector<8x16xf32>
    %88 = arith.divf %86, %87 : vector<8x16xf32>
    %89 = math.sqrt %88 : vector<8x16xf32>
    %90 = arith.mulf %31, %82 : vector<8x16xf32>
    %91 = arith.addf %19, %90 : vector<8x16xf32>
    %92 = arith.mulf %31, %89 : vector<8x16xf32>
    %93 = arith.mulf %31, %31 : vector<8x16xf32>
    %94 = arith.mulf %19, %19 : vector<8x16xf32>
    %95 = arith.addf %93, %94 : vector<8x16xf32>
    %cst_44 = arith.constant 1.000000e+00 : f32
    %96 = vector.broadcast %cst_44 : f32 to vector<8x16xf32>
    %97 = arith.subf %95, %96 : vector<8x16xf32>
    %cst_45 = arith.constant 5.000000e-01 : f32
    %98 = vector.broadcast %cst_45 : f32 to vector<8x16xf32>
    %99 = arith.mulf %98, %97 : vector<8x16xf32>
    %100 = math.log %31 : vector<8x16xf32>
    %101 = arith.subf %99, %100 : vector<8x16xf32>
    %cst_46 = arith.constant dense<0.000000e+00> : vector<8xf32>
    %102 = vector.multi_reduction <add>, %101, %cst_46 [1] : vector<8x16xf32> to vector<8xf32>
    %103 = vector.shape_cast %102 : vector<8xf32> to vector<8x1xf32>
    %c0_47 = arith.constant 0 : index
    %c0_48 = arith.constant 0 : index
    %104 = vector.load %arg11[%c0_47, %c0_48] : memref<8x2xf32, #tpu.memory_space<vmem>>, vector<8x1xf32>
    tpu.vector_store %arg11[%c0_47, %c0_48], %103 {strides = array<i32>} : memref<8x2xf32, #tpu.memory_space<vmem>>, vector<8x1xf32>,
    %105 = arith.mulf %92, %92 : vector<8x16xf32>
    %106 = arith.mulf %91, %91 : vector<8x16xf32>
    %107 = arith.addf %105, %106 : vector<8x16xf32>
    %cst_49 = arith.constant 1.000000e+00 : f32
    %108 = vector.broadcast %cst_49 : f32 to vector<8x16xf32>
    %109 = arith.subf %107, %108 : vector<8x16xf32>
    %cst_50 = arith.constant 5.000000e-01 : f32
    %110 = vector.broadcast %cst_50 : f32 to vector<8x16xf32>
    %111 = arith.mulf %110, %109 : vector<8x16xf32>
    %112 = math.log %92 : vector<8x16xf32>
    %113 = arith.subf %111, %112 : vector<8x16xf32>
    %cst_51 = arith.constant dense<0.000000e+00> : vector<8xf32>
    %114 = vector.multi_reduction <add>, %113, %cst_51 [1] : vector<8x16xf32> to vector<8xf32>
    %115 = vector.shape_cast %114 : vector<8xf32> to vector<8x1xf32>
    %c0_52 = arith.constant 0 : index
    %c1 = arith.constant 1 : index
    %116 = vector.load %arg11[%c0_52, %c1] : memref<8x2xf32, #tpu.memory_space<vmem>>, vector<8x1xf32>
    tpu.vector_store %arg11[%c0_52, %c1], %115 {strides = array<i32>} : memref<8x2xf32, #tpu.memory_space<vmem>>, vector<8x1xf32>,
    return
  }
}

</mosaic_0001>

<bundles_post_ra>
// kernel: tpu_custom_call.1
= control target key start
LH: loop header
LB: loop body
LE: loop exit
PB: predicated region body
PF: predicated region fallthrough
CT: control target
= control target key end

     0   :  { %v1476_v3 = vmov 0.0|0.0   ;;  %vm1950_vm0 = vmmov 0   ;;  %v1478_v6 = vmov 0.0   ;;  %s1936_s0 = inlined_call_operand.vmem [shape: f32[8,32], index: 0, kind: input, shape index: {}]   ;;  %s1937_s1 = inlined_call_operand.vmem [shape: f32[32,32], index: 1, kind: input, shape index: {}]   ;;  %s1938_s2 = inlined_call_operand.vmem [shape: f32[1,32], index: 2, kind: input, shape index: {}]   ;;  %s1939_s3 = inlined_call_operand.vmem [shape: f32[32,32], index: 3, kind: input, shape index: {}]   ;;  %s1940_s4 = inlined_call_operand.vmem [shape: f32[1,32], index: 4, kind: input, shape index: {}]   ;;  %s1941_s5 = inlined_call_operand.vmem [shape: f32[32,16], index: 5, kind: input, shape index: {}]   ;;  %s1942_s6 = inlined_call_operand.vmem [shape: f32[1,16], index: 6, kind: input, shape index: {}]   ;;  %s1943_s7 = inlined_call_operand.vmem [shape: f32[32,16], index: 7, kind: input, shape index: {}]   ;;  %s1944_s8 = inlined_call_operand.vmem [shape: f32[1,16], index: 8, kind: input, shape index: {}]   ;;  %s1945_s9 = inlined_call_operand.vmem [shape: f32[8,128], index: 9, kind: input, shape index: {}]   ;;  %s1946_s10 = inlined_call_operand.hbm [shape: f32[8,128], index: 10, kind: output, shape index: {0}]   ;;  %s1947_s11 = inlined_call_operand.vmem [shape: f32[8,2], index: 11, kind: output, shape index: {1}]  }
   0x1   :  { %v39_v0 = vld [vmem:[%s1937_s1] sm:$0xff]  ;;  %v40_v1 = vld [vmem:[%s1937_s1 + $0x8] sm:$0xff]  ;;  %v41_v2 = vld [vmem:[%s1937_s1 + $0x10] sm:$0xff]  ;;  %1356 = vmatprep.subr.bf16.mxu0 %v1476_v3  ;;  %1229 = vmatprep.mubr.msk.f32.mxu0 %vm1950_vm0, %v1478_v6 }
   0x2   :  { %v1357_v4 = vpack.c.bf16 %v40_v1, %v39_v0  ;;  %v42_v5 = vld [vmem:[%s1937_s1 + $0x18] sm:$0xff]  ;;  %v125_v7 = vld [vmem:[%s1939_s3] sm:$0xff]  ;;  %1362 = vmatprep.subr.bf16.mxu1 %v1476_v3  ;;  %v126_v8 = vld [vmem:[%s1939_s3 + $0x8] sm:$0xff]  ;;  %1240 = vmatprep.mubr.msk.f32.mxu1 %vm1950_vm0, %v1478_v6 }
   0x3   :  { %17 = vsyncpa [#allocation3], 0  ;;  %v1360_v9 = vpack.c.bf16 %v42_v5, %v41_v2  ;;  %v1363_v10 = vpack.c.bf16 %v126_v8, %v125_v7  ;;  %v38_v11 = vld [vmem:[%s1936_s0] sm:$0xff]  ;;  %vm50_vm1 = vcmask 261120   ;;  %v127_v12 = vld [vmem:[%s1939_s3 + $0x10] sm:$0xff]  ;;  %v389_v37 = vlaneseq }
   0x4   :  { %1358 = vmatpush3.bf16.msra.mxu0 %v1357_v4  ;;  %v128_v13 = vld [vmem:[%s1939_s3 + $0x18] sm:$0xff]  ;;  %v210_v15 = vld [vmem:[%s1941_s5] sm:$0xff]  ;;  %v211_v16 = vld [vmem:[%s1941_s5 + $0x8] sm:$0xff]  ;;  %v1479_v43 = vmov 1.0|1.0   ;;  %vm1953_vm8 = vcmask 130048  }
   0x5   :  { %1359 = vmatprep.subr.bf16.mxu0 %v1476_v3  ;;  %1364 = vmatpush3.bf16.msra.mxu1 %v1363_v10  ;;  %v1366_v14 = vpack.c.bf16 %v128_v13, %v127_v12  ;;  %v1369_v17 = vpack.c.bf16 %v211_v16, %v210_v15  ;;  %v1089_v18 = vld [vmem:[%s1938_s2] ss:$0 sm:$0xff]  ;;  %v295_v20 = vld [vmem:[%s1943_s7 + $0x8] sm:$0xff]  ;;  %v212_v26 = vld [vmem:[%s1941_s5 + $0x10] sm:$0xff]  ;;  %v1624_v38 = vshrl.u32 %v389_v37, 7  ;;  %v1626_v39 = vand.u32 127, %v389_v37 }
   0x6   :  { %1365 = vmatprep.subr.bf16.mxu1 %v1476_v3  ;;  %v294_v19 = vld [vmem:[%s1943_s7] sm:$0xff]  ;;  %v213_v27 = vld [vmem:[%s1941_s5 + $0x18] sm:$0xff]  ;;  %v296_v28 = vld [vmem:[%s1943_s7 + $0x10] sm:$0xff] }
   0x7   :  { %v1375_v24 = vpack.c.bf16 %v295_v20, %v294_v19  ;;  %v1372_v29 = vpack.c.bf16 %v213_v27, %v212_v26  ;;  %v297_v30 = vld [vmem:[%s1943_s7 + $0x18] sm:$0xff]  ;;  %v1091_v32 = vld [vmem:[%s1940_s4] ss:$0 sm:$0xff]  ;;  %v391_v40 = vadd.s32 8, %v1624_v38  ;;  %v398_v41 = vand.u32 15, %v1626_v39 }
   0x8   :  { %1361 = vmatpush3.bf16.msra.mxu0 %v1360_v9  ;;  %v1378_v31 = vpack.c.bf16 %v297_v30, %v296_v28  ;;  %v430_v44 = vand.u32 15, %v1624_v38  ;;  %v1093_v48 = vld [vmem:[%s1942_s6] ss:$0 sm:$0xff]  ;;  %v412_v61 = vadd.s32 16, %v1624_v38  ;;  %v413_v62 = vadd.s32 24, %v1624_v38 }
   0x9   :  { %1368 = vmatprep.subr.bf16.mxu0 %v1476_v3  ;;  %1367 = vmatpush3.bf16.msra.mxu1 %v1366_v14  ;;  %vm406_vm2 = vcmp.eq.s32.totalorder %v1624_v38, %v398_v41  ;;  %vm407_vm3 = vcmp.eq.s32.totalorder %v391_v40, %v398_v41  ;;  %v437_v45 = vand.u32 15, %v391_v40  ;;  %v1095_v49 = vld [vmem:[%s1944_s8] ss:$0 sm:$0xff]  ;;  %v414_v2 = vadd.s32 32, %v1624_v38 }
   0xa   :  { %1374 = vmatprep.subr.bf16.mxu1 %v1476_v3  ;;  %vm1631_vm4 = vmpackc.low %vm407_vm3, %vm406_vm2  ;;  %vm1645_vm5 = vcmp.eq.s32.totalorder %v430_v44, %v1626_v39  ;;  %v444_v1 = vand.u32 15, %v412_v61  ;;  %v415_v4 = vadd.s32 40, %v1624_v38  ;;  %v451_v7 = vand.u32 15, %v413_v62 }
   0xb   :  { %1230 = vmatmul.mubr.msk.f32.vlgmr.msra.gmra.mrb[0].mxu0 %vm50_vm1, %v38_v11  ;;  %vm1650_vm6 = vcmp.eq.s32.totalorder %v437_v45, %v1626_v39  ;;  %v458_v12 = vand.u32 15, %v414_v2  ;;  %v416_v16 = vadd.s32 48, %v1624_v38  ;;  %v420_v28 = vadd.s32 80, %v1624_v38 }
   0xc   :  { %1251 = vmatprep.mubr.msk.f32.mxu0 %vm1950_vm0, %v1478_v6  ;;  %1370 = vmatpush3.bf16.msra.mxu0 %v1369_v17  ;;  %vm1952_vm7 = vmpackc.low %vm1650_vm6, %vm1645_vm5  ;;  %vm1679_vm10 = vcmp.eq.s32.totalorder %v444_v1, %v1626_v39  ;;  %v465_v13 = vand.u32 15, %v415_v4  ;;  %vm1686_vm12 = vcmp.eq.s32.totalorder %v451_v7, %v1626_v39  ;;  %v417_v17 = vadd.s32 56, %v1624_v38 }
   0xd   :  { %1371 = vmatprep.subr.bf16.mxu0 %v1476_v3  ;;  %vm1949_vm13 = vmpackc.low %vm1686_vm12, %vm1679_vm10  ;;  %vm1713_vm14 = vcmp.eq.s32.totalorder %v458_v12, %v1626_v39  ;;  %v422_v40 = vadd.s32 96, %v1624_v38  ;;  %v1982_v41 = vmov 0  ;;  %v423_v45 = vadd.s32 104, %v1624_v38 }
   0xe   :  { %vm1718_vm15 = vcmp.eq.s32.totalorder %v465_v13, %v1626_v39  ;;  %v1994_v61 = vmov 0 }
  0x10   :  { %1373 = vmatpush3.bf16.msra.mxu0 %v1372_v29  ;;  %v421_v29 = vadd.s32 88, %v1624_v38 }
  0x11   :  { %1380 = vmatprep.subr.bf16.mxu0 %v1476_v3 }
  0x12   :  { %v507_v37 = vand.u32 15, %v421_v29 }
  0xde   :  { %v120_v21 = vpop.f32.mrb[0].mxu0 }
  0xdf   :  { %v121_v22 = vadd.f32 %v1089_v18, %v120_v21  ;;  %v1231_v23 = vpop.f32.mrb[1].mxu0 }
  0xe0   :  { %v472_v23 = vand.u32 15, %v416_v16 }
  0xe1   :  { %v124_v25 = vmax.f32 %v121_v22, 0.0  ;;  %v418_v22 = vadd.s32 64, %v1624_v38 }
  0xe2   :  { %vm1738_vm2 = vcmp.eq.s32.totalorder %v472_v23, %v1626_v39 }
  0xe3   :  { %1241 = vmatmul.mubr.msk.f32.vlgmr.msra.gmra.mrb[0].mxu1 %vm50_vm1, %v124_v25  ;;  %v419_v25 = vadd.s32 72, %v1624_v38  ;;  %v486_v27 = vand.u32 15, %v418_v22 }
  0xe4   :  { %1376 = vmatpush3.bf16.msra.mxu1 %v1375_v24  ;;  %1262 = vmatprep.mubr.msk.f32.mxu1 %vm1950_vm0, %v1478_v6  ;;  %v479_v24 = vand.u32 15, %v417_v17 }
  0xe5   :  { %1377 = vmatprep.subr.bf16.mxu1 %v1476_v3 }
  0xe6   :  { %vm1743_vm3 = vcmp.eq.s32.totalorder %v479_v24, %v1626_v39 }
  0xe8   :  { %1379 = vmatpush3.bf16.msra.mxu1 %v1378_v31 }
  0xe9   :  { %1383 = vmatprep.subr.bf16.mxu1 %v1476_v3 }
 0x1b6   :  { %v205_v33 = vpop.f32.mrb[0].mxu1 }
 0x1b7   :  { %v206_v34 = vadd.f32 %v1091_v32, %v205_v33  ;;  %v1242_v35 = vpop.f32.mrb[1].mxu1  ;;  %v493_v32 = vand.u32 15, %v419_v25 }
 0x1b8   :  { %v1980_v35 = vmov 0 }
 0x1b9   :  { %v209_v36 = vmax.f32 %v206_v34, 0.0 }
 0x1bb   :  { %1252 = vmatmul.mubr.msk.f32.vlgmr.msra.gmra.mrb[2].mxu0 %vm50_vm1, %v209_v36  ;;  %1263 = vmatmul.mubr.msk.f32.vlgmr.msra.gmra.mrb[2].mxu1 %vm50_vm1, %v209_v36  ;;  %vm1948_vm1 = vmpackc.low %vm1718_vm15, %vm1713_vm14  ;;  %v500_v36 = vand.u32 15, %v420_v28 }
 0x1bc   :  { %1276 = vmatprep.mubr.msk.f32.mxu1 %vm1950_vm0, %v1478_v6  ;;  %1269 = vmatprep.mubr.msk.f32.mxu0 %vm1950_vm0, %v1478_v6 }
 0x1bd   :  { %1385 = vmatpush3.bf16.msk.msra.mxu1 %vm1631_vm4, %v1479_v43  ;;  %1382 = vmatpush3.bf16.msk.msra.mxu0 %vm1631_vm4, %v1479_v43 }
 0x1be   :  { %1386 = vmatprep.subr.bf16.mxu0 %v1476_v3  ;;  %1410 = vmatprep.subr.bf16.mxu1 %v1476_v3 }
 0x28e   :  { %v290_v50 = vpop.f32.mrb[2].mxu0  ;;  %v371_v51 = vpop.f32.mrb[2].mxu1 }
 0x28f   :  { %v1664_v52 = vadd.f32 %v1093_v48, %v290_v50  ;;  %v372_v53 = vadd.f32 %v1095_v49, %v371_v51  ;;  %v1253_v54 = vpop.f32.mrb[3].mxu0  ;;  %v1264_v55 = vpop.f32.mrb[3].mxu1  ;;  %v514_v51 = vand.u32 15, %v422_v40 }
 0x290   :  { %v521_v54 = vand.u32 15, %v423_v45  ;;  %v424_v55 = vadd.s32 112, %v1624_v38 }
 0x291   :  { %v376_v56 = vmin.f32 %v372_v53, 20.0  ;;  %1277 = vmatmul.mubr.msk.f32.vlgmr.msra.gmra.mrb[4].mxu1 %vm1953_vm8, %v1664_v52  ;;  %vm375_vm11 = vcmp.gt.f32.partialorder %v372_v53, 20.0  ;;  %v1046_v19 = vmul.f32 %v1664_v52, %v1664_v52 }
 0x292   :  { %1412 = vmatpush3.bf16.msk.msra.mxu1 %vm1631_vm4, %v1479_v43  ;;  %1318 = vmatprep.mubr.msk.f32.mxu1 %vm1950_vm0, %v1478_v6  ;;  %vm1951_vm4 = vmpackc.low %vm1743_vm3, %vm1738_vm2 }
 0x293   :  { %v377_v57 = vmul.f32 1.442695, %v376_v56  ;;  %1413 = vmatprep.subr.bf16.mxu1 %v1476_v3  ;;  %v425_v56 = vadd.s32 120, %v1624_v38 }
 0x295   :  { %1442 = vpow2.f32 %v377_v57 }
 0x29f   :  { %v1443_v58 = vpop.eup %1442 }
 0x2a0   :  { %v379_v59 = vadd.f32 1.0, %v1443_v58  ;;  %v382_v60 = vmul.f32 -0.5, %v1443_v58  ;;  %v385_v0 = vand.u32 2147483647, %v1443_v58 }
 0x2a2   :  { %1444 = vlog2.f32 %v379_v59  ;;  %v383_v63 = vadd.f32 1.0, %v382_v60  ;;  %vm386_vm9 = vcmp.lt.f32.partialorder %v385_v0, 0.0004427343  ;;  %v535_v59 = vand.u32 15, %v425_v56 }
 0x2a3   :  { %v1992_v60 = vmov 0 }
 0x2a4   :  { %v384_v9 = vmul.f32 %v1443_v58, %v383_v63  ;;  %v528_v58 = vand.u32 15, %v424_v55 }
 0x2ac   :  { %v1445_v5 = vpop.eup %1444 }
 0x2ad   :  { %v381_v8 = vmul.f32 0.6931472, %v1445_v5 }
 0x2af   :  { %v387_v11 = vsel %vm386_vm9, %v384_v9, %v381_v8  ;;  %vm1759_vm9 = vcmp.eq.s32.totalorder %v486_v27, %v1626_v39 }
 0x2b0   :  { %v1683_v14 = vsel %vm375_vm11, %v372_v53, %v387_v11  ;;  %v1981_v35 = vsel %vm1759_vm9, 4294967295, %v1980_v35  ;;  %vm1765_vm11 = vcmp.eq.s32.totalorder %v493_v32, %v1626_v39 }
 0x2b1   :  { %1270 = vmatmul.mubr.msk.f32.vlgmr.msra.gmra.mrb[4].mxu0 %vm1953_vm8, %v1683_v14  ;;  %v1045_v18 = vmul.f32 %v1683_v14, %v1683_v14  ;;  %1446 = vlog2.f32 %v1683_v14  ;;  %v1983_v41 = vsel %vm1765_vm11, 4294967295, %v1982_v41 }
 0x2b2   :  { %1388 = vmatpush3.bf16.msk.msra.mxu0 %vm1952_vm7, %v1479_v43  ;;  %1311 = vmatprep.mubr.msk.f32.mxu0 %vm1950_vm0, %v1478_v6  ;;  %vm1787_vm0 = vcmp.eq.s32.totalorder %v507_v37, %v1626_v39  ;;  %vm1806_vm7 = vcmp.eq.s32.totalorder %v514_v51, %v1626_v39 }
 0x2b3   :  { %1389 = vmatprep.subr.bf16.mxu0 %v1476_v3  ;;  %v1047_v26 = vadd.f32 %v1046_v19, %v1045_v18 }
 0x2b5   :  { %v1156_v33 = vadd.f32 -1.0, %v1047_v26 }
 0x2b6   :  { %1391 = vmatpush3.bf16.msk.msra.mxu0 %vm1949_vm13, %v1479_v43  ;;  %vm1782_vm13 = vcmp.eq.s32.totalorder %v500_v36, %v1626_v39 }
 0x2b7   :  { %1392 = vmatprep.subr.bf16.mxu0 %v1476_v3  ;;  %v1049_v42 = vmul.f32 0.5, %v1156_v33 }
 0x2ba   :  { %1394 = vmatpush3.bf16.msk.msra.mxu0 %vm1948_vm1, %v1479_v43  ;;  %vm1954_vm1 = vmpackc.low %vm1765_vm11, %vm1759_vm9  ;;  %vm1827_vm9 = vcmp.eq.s32.totalorder %v528_v58, %v1626_v39  ;;  %vm1832_vm11 = vcmp.eq.s32.totalorder %v535_v59, %v1626_v39 }
 0x2bb   :  { %v1447_v34 = vpop.eup %1446  ;;  %1395 = vmatprep.subr.bf16.mxu0 %v1476_v3  ;;  %v1993_v60 = vsel %vm1827_vm9, 4294967295, %v1992_v60  ;;  %v1995_v61 = vsel %vm1832_vm11, 4294967295, %v1994_v61 }
 0x2bc   :  { %v1051_v44 = vmul.f32 0.6931472, %v1447_v34 }
 0x2be   :  { %1397 = vmatpush3.bf16.msk.msra.mxu0 %vm1951_vm4, %v1479_v43  ;;  %v1052_v48 = vsub.f32 %v1049_v42, %v1051_v44  ;;  %vm1957_vm4 = vmpackc.low %vm1787_vm0, %vm1782_vm13 }
 0x2bf   :  { %1398 = vmatprep.subr.bf16.mxu0 %v1476_v3 }
 0x2c0   :  { %v1053_v53 = vsel %vm1953_vm8, %v1052_v48, 0.0  ;;  %vm1811_vm8 = vcmp.eq.s32.totalorder %v521_v54, %v1626_v39  ;;  %v666_v39 = vld [vmem:[%s1945_s9] sm:$0xff]  ;;  %s1480_s9 = smov [#allocation2]  }
 0x2c1   :  { %1054 = vadd.xlane.f32.xlu0 %v1053_v53  ;;  %s1077_s0 = sshll.u32 %s1480_s9, 4  ;;  %s1078_s0 = int_to_ptr.vmem [resolvable:$true] %s1077_s0 }
 0x2c2   :  { %1400 = vmatpush3.bf16.msk.msra.mxu0 %vm1954_vm1, %v1479_v43  ;;  %vm1958_vm1 = vmpackc.low %vm1811_vm8, %vm1806_vm7  ;;  %s1452_s15 = scalar_lea.vmem %s1078_s0, 128  ;;  %p1457_p1 = scmp.lt.s32.totalorder %s1078_s0, %s1078_s0 }
 0x2c3   :  { %1401 = vmatprep.subr.bf16.mxu0 %v1476_v3  ;;  %p1453_p0 = scmp.ne.s32.totalorder %s1078_s0, %s1452_s15  ;;  %p1458_p2 = scmp.lt.s32.totalorder %s1452_s15, %s1452_s15 }
 0x2c5   :  { %p1459_p3 = por %p1458_p2, %p1457_p1 }
 0x2c6   :  { %1403 = vmatpush3.bf16.msk.msra.mxu0 %vm1957_vm4, %v1479_v43  ;;  %vm1959_vm4 = vmpackc.low %vm1832_vm11, %vm1827_vm9 }
 0x2c7   :  { %1404 = vmatprep.subr.bf16.mxu0 %v1476_v3  ;;  %vm1997_vm9 = vmpackc.low %vm1650_vm6, %vm1645_vm5  ;;  %p1460_p4 = pnand %p1459_p3, %p1453_p0 }
 0x2c8   :  { %vm1999_vm11 = vmpackc.low %vm1686_vm12, %vm1679_vm10  ;;  %vm2002_vm10 = vnez %v1983_v41  ;;  %vm2003_vm12 = vnez %v1981_v35 }
 0x2c9   :  { %vm2000_vm5 = vmpackc.low %vm1718_vm15, %vm1713_vm14 }
 0x2ca   :  { %1406 = vmatpush3.bf16.msk.msra.mxu0 %vm1958_vm1, %v1479_v43  ;;  %vm1056_vm1 = vcmask 7168   ;;  %vm2001_vm6 = vmpackc.low %vm1743_vm3, %vm1738_vm2  ;;  %vm2007_vm2 = vnez %v1995_v61  ;;  %vm2008_vm3 = vnez %v1993_v60 }
 0x2cb   :  { %1407 = vmatprep.subr.bf16.mxu0 %v1476_v3  ;;  %vm2005_vm14 = vmpackc.low %vm1787_vm0, %vm1782_vm13 }
 0x2cc   :  { %vm2006_vm15 = vmpackc.low %vm1811_vm8, %vm1806_vm7  ;;  %vm2010_vm8 = vcmask 130048  }
 0x2ce   :  { %1409 = vmatpush3.bf16.msk.msra.mxu0 %vm1959_vm4, %v1479_v43  ;;  %vm1996_vm4 = vcmask 130048  }
 0x2d1   :  { %1312 = vmatmul.mubr.f32.vlgmr.msra.gmra.mrb[6].mxu0 %v666_v39 }
 0x34e   :  { %v1055_v62 = vpop.xlane.xlu0 %1054 }
 0x34f   :  { %1057 = vst.msk [vmem:[%s1947_s11] sm:$0xff] %vm1056_vm1, %v1055_v62  ;;  %vm1998_vm1 = vmmov 0  }
 0x364   :  { %v811_v63 = vpop.f32.mrb[4].mxu1 }
 0x365   :  { %v1278_v0 = vpop.f32.mrb[5].mxu1 }
 0x384   :  { %v737_v1 = vpop.f32.mrb[4].mxu0 }
 0x385   :  { %v741_v2 = vmul.f32 %v737_v1, %v666_v39  ;;  %v1271_v4 = vpop.f32.mrb[5].mxu0 }
 0x387   :  { %v812_v5 = vadd.f32 %v811_v63, %v741_v2 }
 0x389   :  { %815 = vst [vmem:[#allocation2] sm:$0xff] %v812_v5 }
 0x3a4   :  { %v882_v7 = vpop.f32.mrb[6].mxu0 }
 0x3a5   :  { %v887_v8 = vmul.f32 0.125, %v882_v7  ;;  %v1313_v9 = vpop.f32.mrb[7].mxu0 }
 0x3a7   :  { %1319 = vmatmul.mubr.msk.f32.vlgmr.msra.gmra.mrb[6].mxu1 %vm1996_vm4, %v887_v8  ;;  %vm2004_vm4 = vmpackc.low %vm2002_vm10, %vm2003_vm12  ;;  %v1042_v15 = vmul.f32 %v887_v8, %v1683_v14 }
 0x3a8   :  { %1415 = vmatpush3.bf16.msk.msra.mxu1 %vm1997_vm9, %v1479_v43  ;;  %1353 = vmatprep.mubr.msk.f32.mxu1 %vm1998_vm1, %v1478_v6  ;;  %vm2009_vm9 = vmpackc.low %vm2007_vm2, %vm2008_vm3 }
 0x3a9   :  { %1416 = vmatprep.subr.bf16.mxu1 %v1476_v3  ;;  %v1043_v18 = vadd.f32 %v1042_v15, %v1664_v52 }
 0x3ab   :  { %v1059_v21 = vmul.f32 %v1043_v18, %v1043_v18 }
 0x3ac   :  { %1418 = vmatpush3.bf16.msk.msra.mxu1 %vm1999_vm11, %v1479_v43 }
 0x3ad   :  { %1419 = vmatprep.subr.bf16.mxu1 %v1476_v3 }
 0x3b0   :  { %1421 = vmatpush3.bf16.msk.msra.mxu1 %vm2000_vm5, %v1479_v43 }
 0x3b1   :  { %1422 = vmatprep.subr.bf16.mxu1 %v1476_v3 }
 0x3b4   :  { %1424 = vmatpush3.bf16.msk.msra.mxu1 %vm2001_vm6, %v1479_v43 }
 0x3b5   :  { %1425 = vmatprep.subr.bf16.mxu1 %v1476_v3 }
 0x3b8   :  { %1427 = vmatpush3.bf16.msk.msra.mxu1 %vm2004_vm4, %v1479_v43 }
 0x3b9   :  { %1428 = vmatprep.subr.bf16.mxu1 %v1476_v3 }
 0x3bc   :  { %1430 = vmatpush3.bf16.msk.msra.mxu1 %vm2005_vm14, %v1479_v43 }
 0x3bd   :  { %1431 = vmatprep.subr.bf16.mxu1 %v1476_v3 }
 0x3c0   :  { %1433 = vmatpush3.bf16.msk.msra.mxu1 %vm2006_vm15, %v1479_v43 }
 0x3c1   :  { %1434 = vmatprep.subr.bf16.mxu1 %v1476_v3 }
 0x3c4   :  { %1436 = vmatpush3.bf16.msk.msra.mxu1 %vm2009_vm9, %v1479_v43 }
 0x47a   :  { %v957_v6 = vpop.f32.mrb[6].mxu1 }
 0x47b   :  { %v961_v46 = vsub.f32 %v666_v39, %v957_v6  ;;  %v1320_v47 = vpop.f32.mrb[7].mxu1 }
 0x47d   :  { %v962_v10 = vmul.f32 %v961_v46, %v961_v46 }
 0x47f   :  { %1354 = vmatmul.mubr.f32.vlgmr.msra.gmra.mrb[8].mxu1 %v962_v10 }
 0x552   :  { %v1029_v11 = vpop.f32.mrb[8].mxu1 }
 0x553   :  { %v1034_v12 = vmul.f32 0.14285715, %v1029_v11  ;;  %v1355_v13 = vpop.f32.mrb[9].mxu1 }
 0x555   :  { %1448 = vrsqrt.f32 %v1034_v12  ;;  %vm1037_vm0 = vcmp.eq.f32.partialorder %v1034_v12, inf  ;;  %v1040_v17 = vand.u32 2147483648, %v1034_v12  ;;  %vm1039_vm7 = vcmp.eq.f32.partialorder %v1034_v12, 0.0 }
 0x55f   :  { %v1449_v16 = vpop.eup %1448 }
 0x560   :  { %v1036_v3 = vmul.f32 %v1449_v16, %v1034_v12 }
 0x562   :  { %v1038_v19 = vsel %vm1037_vm0, %v1034_v12, %v1036_v3 }
 0x563   :  { %v1041_v43 = vsel %vm1039_vm7, %v1040_v17, %v1038_v19 }
 0x564   :  { %v1044_v20 = vmul.f32 %v1041_v43, %v1683_v14 }
 0x566   :  { %v1058_v22 = vmul.f32 %v1044_v20, %v1044_v20  ;;  %1450 = vlog2.f32 %v1044_v20 }
 0x568   :  { %v1060_v23 = vadd.f32 %v1059_v21, %v1058_v22 }
 0x56a   :  { %v1157_v24 = vadd.f32 -1.0, %v1060_v23 }
 0x56c   :  { %v1062_v26 = vmul.f32 0.5, %v1157_v24 }
 0x570   :  { %v1451_v25 = vpop.eup %1450 }
 0x571   :  { %v1064_v27 = vmul.f32 0.6931472, %v1451_v25 }
 0x573   :  { %v1065_v28 = vsub.f32 %v1062_v26, %v1064_v27 }
 0x575   :  { %v1066_v29 = vsel %vm2010_vm8, %v1065_v28, 0.0 }
 0x576   :  { %1067 = vadd.xlane.f32.xlu0 %v1066_v29 }
 0x577   :  { %1463 = shalt.err (!%p1460_p4)
}
 0x578   :  { %s1464_s18 = scalar_lea.hbm %s1946_s10, 128 }
 0x579   :  { %p1465_p5 = scmp.ne.s32.totalorder %s1946_s10, %s1464_s18  ;;  %p1468_p6 = scmp.lt.u32.totalorder %s1464_s18, %s1946_s10 }
 0x57b   :  { %p1470_p7 = pnand %p1468_p6, %p1465_p5 }
 0x57d   :  { %1473 = shalt.err (!%p1470_p7)
}
 0x57e   :  { %1080 = dma.vmem_to_hbm [thread:$0]  %s1078_s0, 128, %s1946_s10, [#allocation3]   ;;  %vm1069_vm13 = vcmask 15368  }
 0x603   :  { %v1068_v52 = vpop.xlane.xlu0 %1067 }
 0x604   :  { %1070 = vst.msk [vmem:[%s1947_s11] sm:$0xff] %vm1069_vm13, %v1068_v52 }
 0x605   :  { %1474 = dma.done.wait [#allocation3], 128  }
 0x606   :  { %1475 = vsyncadd [#allocation3], 4294967168 }
 0x607   :  { %1088 = vsyncpa [#allocation3], 1 }

</bundles_post_ra>
